<compile_context>
chip_gen: v7x
topology: tpu7x:2x2x1
jax: 0.10.0
libtpu: 0.0.40
codegen_flags: <defaults>
</compile_context>

<pallas_src>
import math
from functools import partial

import jax
import jax.numpy as jnp
from jax import lax
from jax.experimental import pallas as pl
from jax.experimental.pallas import tpu as pltpu


def _pad_len(n):
    """Pad a sequence length to a multiple of 8 (when <=128) or 128 (when >128)."""
    if n <= 128:
        return ((n + 7) // 8) * 8
    return ((n + 127) // 128) * 128


def _heads_per_step(bh, cap=4):
    """Heads folded into one kernel-2 grid step; keep >=2 grid steps when possible."""
    best = 1
    for d in range(1, min(cap, bh) + 1):
        if bh % d == 0 and (bh // d >= 2 or bh == 1):
            best = d
    return best


def _vmem_limit_bytes(block_bytes):
    """Double-buffered block footprint + headroom, capped well below v7x's 64 MiB VMEM."""
    return int(min(32 * 1024 * 1024, max(8 * 1024 * 1024, 2 * block_bytes + 4 * 1024 * 1024)))


# ----------------------- Kernel 1: sparsity measure M (MXU Q@K^T) ------------------------
def _mscore_kernel(q_ref, k_ref, cnt_ref, m_ref, *, inv_LK, CK, n_kc):
    # q_ref  : (TQ, D)      query tile for this (b, h)
    # k_ref  : (Lp, D)      all (padded) keys for this (b, h)
    # cnt_ref: (TQ, Lp)     bf16 sample counts (shared across b, h): cnt[i,k] = #samples of key k
    # m_ref  : (TQ, 1)      output sparsity measure M
    TQ = q_ref.shape[0]
    q = q_ref[...]
    mx = jnp.full((TQ, 1), -1e30, jnp.float32)
    sm = jnp.zeros((TQ, 1), jnp.float32)
    # Static chunking of the key axis keeps the live (TQ, CK) score block in vregs (no spill
    # of a full (TQ, L_K) f32 matrix) while the contraction runs on the MXU.
    for c in range(n_kc):
        k_blk = k_ref[c * CK:(c + 1) * CK, :]                              # (CK, D)
        s = lax.dot_general(q, k_blk, (((1,), (1,)), ((), ())),
                            preferred_element_type=jnp.float32)            # (TQ, CK) on MXU
        cnt = cnt_ref[:, c * CK:(c + 1) * CK].astype(jnp.float32)          # small ints, exact
        # max over sampled keys / sum over sampled keys (duplicates counted, like the reference)
        mx = jnp.maximum(mx, jnp.max(jnp.where(cnt > 0.0, s, -1e30),
                                     axis=-1, keepdims=True))
        sm = sm + jnp.sum(s * cnt, axis=-1, keepdims=True)
    m_ref[...] = mx - sm * inv_LK


# -------- Kernel 2: blocked cumsum(V) context + sparse masked attention row updates --------
def _prob_attn_kernel(idx_smem, idx_ref, qr_ref, k_ref, v_ref, o_ref, upd_scr,
                      *, scale, Tc, n_blk, u, HB):
    # idx_smem: (B*H, u) int32 in SMEM (scalar prefetch)   — row indices for dynamic stores
    # idx_ref : (HB, u, 1) int32 in VMEM                   — same indices, for the vector mask
    # qr_ref  : (HB, u, D)   selected (top-u) queries
    # k_ref   : (HB, Lp, D)
    # v_ref   : (HB, Lp, D)
    # o_ref   : (HB, Lp, D)  output context
    # upd_scr : (u, D)       f32 scratch holding the attention updates (reused per head)
    D = o_ref.shape[-1]
    Lp = k_ref.shape[1]
    bh0 = pl.program_id(0) * HB

    # Hoisted constants (shared by every head in this grid step).
    row = lax.broadcasted_iota(jnp.int32, (Tc, Tc), 0)
    col = lax.broadcasted_iota(jnp.int32, (Tc, Tc), 1)
    tri = (col <= row).astype(v_ref.dtype)            # 0/1 exact; bf16 feeds MXU at bf16 rate
    kpos = lax.broadcasted_iota(jnp.int32, (u, Lp), 1)

    for j in range(HB):                                # static unroll over folded heads
        # ---- Phase 1: initial context = cumsum(V), blocked lower-tri matmul + f32 carry.
        def cs_body(c, carry):
            start = pl.multiple_of(c * Tc, Tc)
            blk = v_ref[j, pl.ds(start, Tc), :]                            # V dtype (no upcast)
            cs = jnp.dot(tri, blk, preferred_element_type=jnp.float32) + carry
            o_ref[j, pl.ds(start, Tc), :] = cs.astype(o_ref.dtype)
            return cs[Tc - 1:Tc, :]                                        # running sum

        lax.fori_loop(0, n_blk, cs_body, jnp.zeros((1, D), jnp.float32), unroll=True)

        # ---- Phase 2: sparse scores for top-u queries, causal ProbMask, softmax, attn @ V.
        s = lax.dot_general(qr_ref[j], k_ref[j], (((1,), (1,)), ((), ())),
                            preferred_element_type=jnp.float32) * scale    # (u, Lp)
        s = jnp.where(kpos > idx_ref[j], -1e30, s)                         # finite -inf stand-in
        m = jnp.max(s, axis=-1, keepdims=True)
        p = jnp.exp(s - m)
        p = p / jnp.sum(p, axis=-1, keepdims=True)
        upd_scr[...] = jnp.dot(p.astype(v_ref.dtype), v_ref[j],
                               preferred_element_type=jnp.float32)         # (u, D)

        # ---- Phase 3: scatter the updated rows via dynamic row stores (indices from SMEM).
        bh = bh0 + j

        def st_body(i, _):
            r = idx_smem[bh, i]
            o_ref[j, pl.ds(r, 1), :] = upd_scr[pl.ds(i, 1), :].astype(o_ref.dtype)
            return 0

        lax.fori_loop(0, u, st_body, 0, unroll=True)


# ---------------------------------------- Wrapper -----------------------------------------
def prob_attention(queries, keys, values, index_sample, *, factor=5, scale=None):
    """ProbAttention forward (mask_flag=True, output_attention=False)."""
    B, L_Q, H, D = queries.shape
    _, L_K, _, _ = keys.shape
    L_V = values.shape[1]
    assert L_Q == L_K == L_V, "mask_flag=True (causal ProbMask) path requires L_Q == L_K == L_V"

    dtype = queries.dtype
    dsz = jnp.dtype(dtype).itemsize
    U_part = min(int(factor * math.ceil(math.log(L_K))), L_K)
    u = min(int(factor * math.ceil(math.log(L_Q))), L_Q)
    assert index_sample.shape == (L_Q, U_part)

    # Head-major layout, B*H collapsed; pad L to a tiling-friendly length (zeros are inert:
    # padded keys are never sampled and always causally masked; padded rows are sliced off).
    Q = jnp.transpose(queries, (0, 2, 1, 3)).reshape(B * H, L_Q, D)
    K = jnp.transpose(keys, (0, 2, 1, 3)).reshape(B * H, L_K, D)
    V = jnp.transpose(values, (0, 2, 1, 3)).reshape(B * H, L_V, D)
    BH = B * H
    Lp = _pad_len(L_Q)
    pad = Lp - L_Q
    if pad:
        Q = jnp.pad(Q, ((0, 0), (0, pad), (0, 0)))
        K = jnp.pad(K, ((0, 0), (0, pad), (0, 0)))
        V = jnp.pad(V, ((0, 0), (0, pad), (0, 0)))

    # Sample-count matrix shared across (b, h); bf16 (counts <= U_part, exactly representable).
    cnt = jnp.zeros((Lp, Lp), jnp.float32).at[
        jnp.arange(L_Q)[:, None], index_sample].add(1.0).astype(jnp.bfloat16)

    TQ = Lp if Lp <= 128 else 128
    CK = Lp if Lp <= 128 else 128
    n_kc = Lp // CK

    # Kernel 1: per-query sparsity measure M. qi is the OUTER grid axis so the cnt block is
    # resident across the inner B*H steps (fetched only Lp/TQ times per call in total).
    k1_block = TQ * D * dsz + Lp * D * dsz + TQ * Lp * 2 + TQ * 4
    M_bh = pl.pallas_call(
        partial(_mscore_kernel, inv_LK=1.0 / L_K, CK=CK, n_kc=n_kc),
        out_shape=jax.ShapeDtypeStruct((BH, Lp, 1), jnp.float32),
        grid=(Lp // TQ, BH),
        in_specs=[
            pl.BlockSpec((None, TQ, D), lambda qi, bh: (bh, qi, 0)),   # Q tile
            pl.BlockSpec((None, Lp, D), lambda qi, bh: (bh, 0, 0)),    # all keys for this head
            pl.BlockSpec((TQ, Lp), lambda qi, bh: (qi, 0)),            # cnt (constant over bh)
        ],
        out_specs=pl.BlockSpec((None, TQ, 1), lambda qi, bh: (bh, qi, 0)),
        compiler_params=pltpu.CompilerParams(
            dimension_semantics=("parallel", "parallel"),
            vmem_limit_bytes=_vmem_limit_bytes(k1_block)),
    )(Q, K, cnt)

    # glue: top-u query selection + Q_reduce gather (tiny).
    # TODO(synk): top-k has no clean in-kernel Pallas equivalent; done with lax.top_k in JAX.
    M = M_bh[..., 0]                                                   # (BH, Lp)
    if pad:
        M = jnp.where(jnp.arange(Lp)[None, :] < L_Q, M, -jnp.inf)      # never pick padded rows
    _, M_top = lax.top_k(M, u)                                         # (BH, u) int32
    M_top = M_top.astype(jnp.int32)
    Q_reduce = jnp.take_along_axis(Q, M_top[..., None], axis=1)        # (BH, u, D)

    scale_val = float(scale) if scale is not None else 1.0 / math.sqrt(D)
    Tc = Lp if Lp <= 128 else 128
    n_blk = Lp // Tc
    HB = _heads_per_step(BH)                                           # heads per grid step

    # Kernel 2: blocked cumsum(V) context + sparse scores + ProbMask softmax + row scatter,
    # HB heads folded per grid step to amortize per-step overhead and enlarge DMAs.
    k2_block = HB * (u * 4 + u * D * dsz + 3 * Lp * D * dsz) + u * D * 4
    grid_spec = pltpu.PrefetchScalarGridSpec(
        num_scalar_prefetch=1,
        grid=(BH // HB,),
        in_specs=[
            pl.BlockSpec((HB, u, 1), lambda g, idx: (g, 0, 0)),        # top-u indices (VMEM)
            pl.BlockSpec((HB, u, D), lambda g, idx: (g, 0, 0)),        # Q_reduce
            pl.BlockSpec((HB, Lp, D), lambda g, idx: (g, 0, 0)),       # K
            pl.BlockSpec((HB, Lp, D), lambda g, idx: (g, 0, 0)),       # V
        ],
        out_specs=pl.BlockSpec((HB, Lp, D), lambda g, idx: (g, 0, 0)),
        scratch_shapes=[pltpu.VMEM((u, D), jnp.float32)],
    )
    context = pl.pallas_call(
        partial(_prob_attn_kernel, scale=scale_val, Tc=Tc, n_blk=n_blk, u=u, HB=HB),
        out_shape=jax.ShapeDtypeStruct((BH, Lp, D), dtype),
        grid_spec=grid_spec,
        compiler_params=pltpu.CompilerParams(
            dimension_semantics=("parallel",),
            vmem_limit_bytes=_vmem_limit_bytes(k2_block)),
    )(M_top, M_top[..., None], Q_reduce, K, V)

    context = context[:, :L_Q, :].reshape(B, H, L_Q, D)
    return context, None   # output_attention=False


# ------------------------------- Pure-JAX reference (checking) ----------------------------
def prob_attention_ref(queries, keys, values, index_sample, *, factor=5, scale=None):
    B, L_Q, H, D = queries.shape
    _, L_K, _, _ = keys.shape
    Q = jnp.transpose(queries, (0, 2, 1, 3)).astype(jnp.float32)
    K = jnp.transpose(keys, (0, 2, 1, 3)).astype(jnp.float32)
    V = jnp.transpose(values, (0, 2, 1, 3)).astype(jnp.float32)
    u = min(int(factor * math.ceil(math.log(L_Q))), L_Q)

    K_sample = K[:, :, index_sample, :]
    QK_sample = jnp.einsum('bhld,bhlsd->bhls', Q, K_sample)
    M = QK_sample.max(-1) - QK_sample.sum(-1) / L_K
    _, M_top = lax.top_k(M, u)
    Q_reduce = jnp.take_along_axis(Q, M_top[..., None], axis=2)
    scale_val = scale if scale is not None else 1.0 / math.sqrt(D)
    scores = jnp.einsum('bhud,bhkd->bhuk', Q_reduce, K) * scale_val
    kpos = jnp.arange(L_K)
    mask = kpos[None, None, None, :] > M_top[..., None]
    scores = jnp.where(mask, -jnp.inf, scores)
    attn = jax.nn.softmax(scores, axis=-1)
    upd = jnp.einsum('bhuk,bhkd->bhud', attn, V)
    ctx = jnp.cumsum(V, axis=2)
    b_idx = jnp.arange(B)[:, None, None]
    h_idx = jnp.arange(H)[None, :, None]
    ctx = ctx.at[b_idx, h_idx, M_top].set(upd)
    return ctx


def _run_case(seed, B, L, H, D, factor=5):
    key = jax.random.PRNGKey(seed)
    kq, kk, kv, ks = jax.random.split(key, 4)
    queries = jax.random.normal(kq, (B, L, H, D), dtype=jnp.float32)
    keys_in = jax.random.normal(kk, (B, L, H, D), dtype=jnp.float32)
    values = jax.random.normal(kv, (B, L, H, D), dtype=jnp.float32)
    # deterministic stand-in for torch.randint(L_K, (L_Q, sample_k))
    U_part = min(int(factor * math.ceil(math.log(L))), L)
    index_sample = jax.random.randint(ks, (L, U_part), 0, L)

    ctx, attn = prob_attention(queries, keys_in, values, index_sample,
                               factor=factor, scale=None)
    ctx = jax.block_until_ready(ctx)
    assert ctx.shape == (B, H, L, D)
    assert attn is None

    ctx_ref = prob_attention_ref(queries, keys_in, values, index_sample,
                                 factor=factor, scale=None)
    max_err = float(jnp.max(jnp.abs(ctx - ctx_ref)))
    assert max_err < 1e-3, f"mismatch vs reference (B={B},L={L},H={H},D={D}): {max_err}"


if __name__ == "__main__":
    # Primary small case (L_Q = L_K = L required by the mask_flag=True path).
    _run_case(0, B=2, L=16, H=4, D=16)
    # Exercise the padding path (L=20 -> Lp=24) and single-head-per-step folding.
    _run_case(0, B=1, L=20, H=2, D=32)
    print("KERNEL_OK")
</pallas_src>

<mosaic_0001>
module attributes {stable_mosaic.version = 11 : i64} {
  func.func @_mscore_kernel(%arg0: i32, %arg1: i32, %arg2: memref<1x16x16xf32, #tpu.memory_space<vmem>>, %arg3: memref<1x16x16xf32, #tpu.memory_space<vmem>>, %arg4: memref<16x16xbf16, #tpu.memory_space<vmem>>, %arg5: memref<1x16x1xf32, #tpu.memory_space<vmem>>) attributes {dimension_semantics = [#tpu.dimension_semantics<parallel>, #tpu.dimension_semantics<parallel>], iteration_bounds = array<i64: 1, 8>, scalar_prefetch = 0 : i64, scratch_operands = 0 : i64, tpu.core_type = #tpu.core_type<tc>, window_params = [{transform_indices = @transform_0, window_bounds = array<i64: 1, 16, 16>}, {transform_indices = @transform_1, window_bounds = array<i64: 1, 16, 16>}, {transform_indices = @transform_2, window_bounds = array<i64: 16, 16>}, {transform_indices = @transform_3, window_bounds = array<i64: 1, 16, 1>}]} {
    %c0 = arith.constant 0 : index
    %c0_0 = arith.constant 0 : index
    %c0_1 = arith.constant 0 : index
    %0 = vector.load %arg2[%c0, %c0_0, %c0_1] : memref<1x16x16xf32, #tpu.memory_space<vmem>>, vector<1x16x16xf32>
    %1 = vector.shape_cast %0 : vector<1x16x16xf32> to vector<16x16xf32>
    %cst = arith.constant -1.000000e+30 : f32
    %2 = vector.broadcast %cst : f32 to vector<16x1xf32>
    %cst_2 = arith.constant 0.000000e+00 : f32
    %3 = vector.broadcast %cst_2 : f32 to vector<16x1xf32>
    %c0_3 = arith.constant 0 : index
    %c0_4 = arith.constant 0 : index
    %c0_5 = arith.constant 0 : index
    %4 = vector.load %arg3[%c0_3, %c0_4, %c0_5] : memref<1x16x16xf32, #tpu.memory_space<vmem>>, vector<1x16x16xf32>
    %5 = vector.shape_cast %4 : vector<1x16x16xf32> to vector<16x16xf32>
    %cst_6 = arith.constant dense<0.000000e+00> : vector<16x16xf32>
    %6 = tpu.matmul %1, %5, %cst_6 {dimension_numbers = #tpu.dot_dimension_numbers<[1], [1], [0], [0], [0, 0, 1, 0], [], []>} : vector<16x16xf32>, vector<16x16xf32>, vector<16x16xf32> -> vector<16x16xf32>
    %c0_7 = arith.constant 0 : index
    %c0_8 = arith.constant 0 : index
    %7 = vector.load %arg4[%c0_7, %c0_8] : memref<16x16xbf16, #tpu.memory_space<vmem>>, vector<16x16xbf16>
    %8 = arith.extf %7 : vector<16x16xbf16> to vector<16x16xf32>
    %cst_9 = arith.constant 0.000000e+00 : f32
    %9 = vector.broadcast %cst_9 : f32 to vector<16x16xf32>
    %10 = arith.cmpf ogt, %8, %9 : vector<16x16xf32>
    %cst_10 = arith.constant -1.000000e+30 : f32
    %11 = vector.broadcast %cst_10 : f32 to vector<16x16xf32>
    %12 = arith.select %10, %6, %11 : vector<16x16xi1>, vector<16x16xf32>
    %cst_11 = arith.constant dense<0xFF800000> : vector<16xf32>
    %13 = vector.multi_reduction <maximumf>, %12, %cst_11 [1] : vector<16x16xf32> to vector<16xf32>
    %14 = vector.shape_cast %13 : vector<16xf32> to vector<16x1xf32>
    %15 = arith.maximumf %2, %14 : vector<16x1xf32>
    %16 = arith.mulf %6, %8 : vector<16x16xf32>
    %cst_12 = arith.constant dense<0.000000e+00> : vector<16xf32>
    %17 = vector.multi_reduction <add>, %16, %cst_12 [1] : vector<16x16xf32> to vector<16xf32>
    %18 = vector.shape_cast %17 : vector<16xf32> to vector<16x1xf32>
    %19 = arith.addf %3, %18 : vector<16x1xf32>
    %cst_13 = arith.constant 6.250000e-02 : f32
    %20 = vector.broadcast %cst_13 : f32 to vector<16x1xf32>
    %21 = arith.mulf %19, %20 : vector<16x1xf32>
    %22 = arith.subf %15, %21 : vector<16x1xf32>
    %c0_14 = arith.constant 0 : index
    %c0_15 = arith.constant 0 : index
    %c0_16 = arith.constant 0 : index
    %23 = vector.load %arg5[%c0_14, %c0_15, %c0_16] : memref<1x16x1xf32, #tpu.memory_space<vmem>>, vector<1x16x1xf32>
    %24 = vector.shape_cast %23 : vector<1x16x1xf32> to vector<16x1xf32>
    %25 = vector.shape_cast %22 : vector<16x1xf32> to vector<1x16x1xf32>
    tpu.vector_store %arg5[%c0_14, %c0_15, %c0_16], %25 {strides = array<i32>} : memref<1x16x1xf32, #tpu.memory_space<vmem>>, vector<1x16x1xf32>,
    return
  }
  func.func @transform_0(%arg0: i32, %arg1: i32) -> (i32, i32, i32) {
    %c0_i32 = arith.constant 0 : i32
    %c0_i32_0 = arith.constant 0 : i32
    return %arg1, %arg0, %c0_i32 : i32, i32, i32
  }
  func.func @transform_1(%arg0: i32, %arg1: i32) -> (i32, i32, i32) {
    %c0_i32 = arith.constant 0 : i32
    %c0_i32_0 = arith.constant 0 : i32
    %c0_i32_1 = arith.constant 0 : i32
    return %arg1, %c0_i32, %c0_i32_0 : i32, i32, i32
  }
  func.func @transform_2(%arg0: i32, %arg1: i32) -> (i32, i32) {
    %c0_i32 = arith.constant 0 : i32
    %c0_i32_0 = arith.constant 0 : i32
    return %arg0, %c0_i32 : i32, i32
  }
  func.func @transform_3(%arg0: i32, %arg1: i32) -> (i32, i32, i32) {
    %c0_i32 = arith.constant 0 : i32
    %c0_i32_0 = arith.constant 0 : i32
    return %arg1, %arg0, %c0_i32 : i32, i32, i32
  }
}

</mosaic_0001>

<bundles_post_ra>
// kernel: tpu_custom_call.1
= control target key start
LH: loop header
LB: loop body
LE: loop exit
PB: predicated region body
PF: predicated region fallthrough
CT: control target
= control target key end

     0   :  { %8 = vsyncpa [#allocation3], 0  ;;  %s1055_s0 = inlined_call_operand.hbm [shape: f32[8,16,16], index: 0, kind: input, shape index: {}]   ;;  %s1056_s1 = inlined_call_operand.hbm [shape: f32[8,16,16], index: 1, kind: input, shape index: {}]   ;;  %s1057_s2 = inlined_call_operand.hbm [shape: bf16[16,16], index: 2, kind: input, shape index: {}]   ;;  %s1058_s3 = inlined_call_operand.vmem [shape: f32[8,16,1], index: 3, kind: output, shape index: {}]  }
   0x1   :  { %10 = vsyncpa [#allocation3 + $0x1], 0 }
   0x2   :  { %11 = vsyncpa [#allocation5], 0 }
   0x3   :  { %13 = vsyncpa [#allocation5 + $0x1], 0  ;;  %s833_s12 = smov 0   ;;  %s835_s13 = smov 0  }
   0x4   :  { %s837_s14 = smov 0   ;;  %s839_s15 = smov 0  }
   0x5   :  { %s841_s16 = smov 0   ;;  %s843_s17 = smov 0  }
   0x6 LB: > { %s536_s18 = sadd.s32 4294967295, %s804_s17   ;;  %p53_p0 = scmp.ne.s32.totalorder %s788_s13, %s784_s12  ;;  %s804_s17 = sphi %s843_s17, %s19_s17   ;;  %s800_s16 = sphi %s841_s16, %s1075_s16   ;;  %s796_s15 = sphi %s839_s15, %s1074_s15   ;;  %s792_s14 = sphi %s837_s14, %s1073_s14   ;;  %s788_s13 = sphi %s835_s13, %s1072_s13   ;;  %s784_s12 = sphi %s833_s12, %s1071_s12  }
   0x7   : > { %p865_p1 = scmp.eq.s32.totalorder %s536_s18, 0  ;;  %p538_p2 = scmp.ge.s32.totalorder %s804_s17, 1 }
   0x8   : > { %p144_p3 = scmp.lt.s32.totalorder %s804_s17, 9  ;;  %s806_s22 = smov [#allocation6]  }
   0x9   : > { %s1063_s19 = scalar_select %p865_p1, 1, 0 }
   0xa   : > { %p873_p4 = por %p865_p1, %p53_p0  ;;  %p877_p5 = pnand %p538_p2, %p144_p3 }
   0xb   : > { %s159_s23 = sshll.u32 %s806_s22, 4  ;;  %s28_s25 = sadd.s32 1, %s800_s16  ;;  %s160_s23 = int_to_ptr.vmem [resolvable:$true] %s159_s23 }
   0xc   : > { %s1064_s20 = scalar_select %p873_p4, 1, 0 }
   0xd   : > { %s1065_s21 = scalar_select %p877_p5, 1, 0 }
   0xe   : > { %p591_p6 = pneg %p877_p5  ;;  %s658_s28 = scalar_lea.hbm %s1057_s2, 128 }
   0xf   : > { %p659_p8 = scmp.ne.s32.totalorder %s1057_s2, %s658_s28  ;;  %p665_p12 = scmp.lt.u32.totalorder %s658_s28, %s1057_s2 }
  0x10   : > { %p885_p7 = pnand %p591_p6, %p865_p1 }
  0x12   : > { %p660_p9 = pneg %p885_p7 }
  0x14   : > { %p661_p10 = pnand %p660_p9, %p659_p8 }
  0x16   : > { %p662_p11 = pneg %p661_p10 }
  0x18   : > { %p667_p13 = pnand %p665_p12, %p662_p11 }
  0x1a   : > { %670 = shalt.err (!%p667_p13)
}
  0x1b   : > { %s671_s6 = scalar_lea.vmem %s160_s23, 128  ;;  %p679_p6 = scmp.lt.s32.totalorder %s160_s23, %s160_s23 }
  0x1c   : > { %p672_p0 = scmp.ne.s32.totalorder %s160_s23, %s671_s6  ;;  %p680_p1 = scmp.lt.s32.totalorder %s671_s6, %s671_s6 }
  0x1e   : > { %p674_p2 = pnand %p672_p0, %p660_p9  ;;  %p681_p4 = por %p680_p1, %p679_p6 }
  0x20   : > { %p675_p3 = pneg %p674_p2 }
  0x22   : > { %p682_p5 = pnand %p681_p4, %p675_p3 }
  0x24   : > { %685 = shalt.err (!%p682_p5)
}
  0x25   : > { %s807_s7 = smov 64   ;;  %s808_s8 = smov 4  }
  0x26   : > { %594 = dma.hbm_to_vmem [thread:$0]  (!%p885_p7), %s1057_s2, 128, %s160_s23, [#allocation5], %s807_s7, %s807_s7, %s808_s8  }
  0x27   : > { %p29_p1 = scmp.ge.s32.totalorder %s28_s25, 8  ;;  %s40_s11 = sadd.s32 1, %s792_s14 }
  0x28   : > { %p47_p4 = scmp.ne.s32.totalorder %s792_s14, %s788_s13  ;;  %p48_p5 = scmp.eq.s32.totalorder %s804_s17, 0 }
  0x29   : > { %s1077_s25 = smov (%p29_p1, %s28_s25), 0  ;;  %p603_p9 = scmp.lt.s32.totalorder %s804_s17, 8 }
  0x2a   : > { %p49_p8 = por %p48_p5, %p47_p4  ;;  %s35_s12 = ssub.s32 %s800_s16, %s1077_s25 }
  0x2b   : > { %s173_s22 = sand.u32 1, %s792_s14   ;;  %p38_p10 = scmp.eq.s32.totalorder %s35_s12, 0 }
  0x2c   : > { %s916_s26 = sshll.u32 %s173_s22, 4  ;;  %s559_s24 = sshll.u32 %s800_s16, 8 }
  0x2d   : > { %s920_s27 = scalar_select %p38_p10, %s792_s14, %s40_s11  }
  0x2e   : > { %s927_s29 = scalar_lea.hbm %s1055_s0, %s559_s24  ;;  %s177_s30 = scalar_lea.vmem [#allocation2], %s916_s26 }
  0x2f   : > { %s186_s4 = sshll.u32 %s177_s30, 4  ;;  %p930_p7 = pnand %p603_p9, %p49_p8  ;;  %s934_s4 = int_to_ptr.vmem [resolvable:$true] %s186_s4 }
  0x30   : > { %s936_s6 = scalar_lea.sflag [#allocation3], %s173_s22  ;;  %s686_s7 = scalar_lea.hbm %s927_s29, 256 }
  0x31   : > { %p687_p11 = scmp.ne.s32.totalorder %s927_s29, %s686_s7  ;;  %p688_p12 = pneg %p930_p7 }
  0x32   : > { %s691_s10 = scalar_lea.hbm %s1055_s0, 2048  ;;  %p692_p2 = scmp.lt.u32.totalorder %s927_s29, %s1055_s0 }
  0x33   : > { %p689_p13 = pnand %p688_p12, %p687_p11  ;;  %p693_p3 = scmp.lt.u32.totalorder %s691_s10, %s686_s7 }
  0x34   : > { %p695_p1 = scmp.lt.u32.totalorder %s686_s7, %s927_s29 }
  0x35   : > { %p690_p0 = pneg %p689_p13  ;;  %p694_p6 = por %p693_p3, %p692_p2 }
  0x37   : > { %p696_p4 = por %p695_p1, %p694_p6 }
  0x39   : > { %p697_p5 = pnand %p696_p4, %p690_p0 }
  0x3b   : > { %700 = shalt.err (!%p697_p5)
}
  0x3c   : > { %s701_s22 = scalar_lea.vmem %s934_s4, 256  ;;  %s809_s23 = smov [#allocation2]  }
  0x3d   : > { %p702_p8 = scmp.ne.s32.totalorder %s934_s4, %s701_s22  ;;  %s706_s28 = sshll.u32 %s809_s23, 4  ;;  %s707_s28 = int_to_ptr.vmem [resolvable:$false] %s706_s28 }
  0x3e   : > { %s708_s30 = scalar_lea.vmem %s707_s28, 512  ;;  %p709_p11 = scmp.lt.s32.totalorder %s934_s4, %s707_s28 }
  0x3f   : > { %p704_p9 = pnand %p702_p8, %p688_p12  ;;  %p710_p13 = scmp.lt.s32.totalorder %s708_s30, %s701_s22 }
  0x41   : > { %p705_p10 = pneg %p704_p9  ;;  %p711_p2 = por %p710_p13, %p709_p11 }
  0x43   : > { %p712_p3 = pnand %p711_p2, %p705_p10 }
  0x45   : > { %715 = shalt.err (!%p712_p3)
}
  0x46   : > { %s810_s7 = smov 128   ;;  %s811_s8 = smov 8  }
  0x47   : > { %598 = dma.hbm_to_vmem [thread:$0]  (!%p930_p7), %s927_s29, 256, %s934_s4, %s936_s6, %s810_s7, %s810_s7, %s811_s8  }
  0x48   : > { %s972_s11 = scalar_lea.hbm %s1056_s1, %s559_s24  ;;  %s200_s12 = scalar_lea.vmem [#allocation4], %s916_s26 }
  0x49   : > { %s207_s22 = sshll.u32 %s200_s12, 4  ;;  %s196_s23 = sand.u32 1, %s804_s17   ;;  %s976_s22 = int_to_ptr.vmem [resolvable:$true] %s207_s22 }
  0x4a   : > { %s978_s28 = scalar_lea.sflag [#allocation5], %s196_s23  ;;  %s716_s30 = scalar_lea.hbm %s972_s11, 256 }
  0x4b   : > { %p717_p0 = scmp.ne.s32.totalorder %s972_s11, %s716_s30  ;;  %s721_s4 = scalar_lea.hbm %s1056_s1, 2048 }
  0x4c   : > { %p722_p4 = scmp.lt.u32.totalorder %s972_s11, %s1056_s1  ;;  %p723_p5 = scmp.lt.u32.totalorder %s721_s4, %s716_s30 }
  0x4d   : > { %p719_p6 = pnand %p717_p0, %p688_p12  ;;  %p725_p9 = scmp.lt.u32.totalorder %s716_s30, %s972_s11 }
  0x4e   : > { %p724_p8 = por %p723_p5, %p722_p4 }
  0x4f   : > { %p720_p1 = pneg %p719_p6 }
  0x50   : > { %p726_p10 = por %p725_p9, %p724_p8 }
  0x52   : > { %p727_p11 = pnand %p726_p10, %p720_p1 }
  0x54   : > { %730 = shalt.err (!%p727_p11)
}
  0x55   : > { %s731_s26 = scalar_lea.vmem %s976_s22, 256  ;;  %s812_s10 = smov [#allocation4]  }
  0x56   : > { %p732_p13 = scmp.ne.s32.totalorder %s976_s22, %s731_s26  ;;  %s736_s12 = sshll.u32 %s812_s10, 4  ;;  %s737_s12 = int_to_ptr.vmem [resolvable:$false] %s736_s12 }
  0x57   : > { %s738_s23 = scalar_lea.vmem %s737_s12, 512  ;;  %p739_p0 = scmp.lt.s32.totalorder %s976_s22, %s737_s12 }
  0x58   : > { %p734_p2 = pnand %p732_p13, %p688_p12  ;;  %p740_p6 = scmp.lt.s32.totalorder %s738_s23, %s731_s26 }
  0x5a   : > { %p735_p3 = pneg %p734_p2  ;;  %p741_p4 = por %p740_p6, %p739_p0 }
  0x5c   : > { %p742_p5 = pnand %p741_p4, %p735_p3 }
  0x5e   : > { %745 = shalt.err (!%p742_p5)
}
  0x5f   : > { %601 = dma.hbm_to_vmem [thread:$0]  (!%p930_p7), %s972_s11, 256, %s976_s22, %s978_s28, %s810_s7, %s810_s7, %s811_s8  }
  0x60   : > { %p1068_p12 = scmp.ne.s32.totalorder %s1065_s21, 0 }
  0x61   : > { %s221_s30 = sand.u32 (!%p1068_p12), 1, %s788_s13   ;;  %p1069_p1 = scmp.ne.s32.totalorder (!%p1068_p12), %s1064_s20, 0 }
  0x62   : > { %219 = sbr.rel (%p1068_p12) target bundleno = 490 (0x1ea), region = 32  ;;  %s548_s29 = sshll.u32 (!%p1068_p12), %s221_s30, 4 }
  0x63   : > { %s222_s24 = scalar_lea.sflag (!%p1068_p12), [#allocation3], %s221_s30  ;;  %s225_s4 = scalar_lea.vmem (!%p1068_p12), [#allocation2], %s548_s29 }
  0x69   : > { %771 = dma.done.wait (%p1069_p1), %s222_s24, 256  }
  0x6a   : > { %773 = vsyncadd (%p1069_p1), %s222_s24, 4294967040  ;;  %s230_s5 = sand.u32 1, %s536_s18   ;;  %s234_s7 = scalar_lea.vmem [#allocation4], %s548_s29 }
  0x6b   : > { %s231_s6 = scalar_lea.sflag [#allocation5], %s230_s5 }
  0x6c   : > { %775 = dma.done.wait (%p1069_p1), %s231_s6, 256  }
  0x6d   : > { %777 = vsyncadd (%p1069_p1), %s231_s6, 4294967040  ;;  %p1070_p7 = scmp.ne.s32.totalorder %s1063_s19, 0 }
  0x6f   : > { %779 = dma.done.wait (%p1070_p7), [#allocation5], 128  }
  0x70   : > { %781 = vsyncadd (%p1070_p7), [#allocation5], 4294967168  ;;  %vm286_vm0 = vcmask 130048   ;;  %v284_v0 = vld [vmem:[%s234_s7] sm:$0xff]  ;;  %v285_v1 = vld [vmem:[%s234_s7 + $0x8] sm:$0xff]  ;;  %p273_p8 = scmp.lt.s32.totalorder %s796_s15, 7 }
  0x71   : > { %vm578_vm1 = vmpackc.low %vm286_vm0, %vm286_vm0  ;;  %v282_v2 = vld [vmem:[%s225_s4] sm:$0xff]  ;;  %v577_v3 = vpack.c.bf16 %v285_v1, %v284_v0  ;;  %v283_v4 = vld [vmem:[%s225_s4 + $0x8] sm:$0xff]  ;;  %vm404_vm4 = vcmask 7168  }
  0x72   : > { %574 = vmatprep.mubr.msk.f32.mxu0 %vm286_vm0, %v282_v2  ;;  %v563_v5 = vld [vmem:[#allocation6] sm:$0xff]   ;;  %s1079_s15 = smov (!%p273_p8, %s796_s15), 7 }
  0x73   : > { %579 = vmatprep.subr.msk.bf16.mxu0 %vm578_vm1, %v577_v3  ;;  %v564_v6 = vunpack.c.l.bf16 %v563_v5  ;;  %v565_v7 = vunpack.c.h.bf16 %v563_v5  ;;  %s561_s18 = sshll.u32 %s1079_s15, 4 }
  0x74   : > { %582 = vmatpush3.bf16.xpose.msk.msra.mxu0 %vm578_vm1, %v577_v3  ;;  %s280_s21 = scalar_lea.vmem %s1058_s3, %s561_s18 }
  0x75   : > { %vm378_vm2 = vcmp.gt.f32.partialorder %v564_v6, 0.0  ;;  %vm379_vm3 = vcmp.gt.f32.partialorder %v565_v7, 0.0 }
  0x7b   : > { %575 = vmatmul.mubr.msk.f32.vlgmr.msra.gmra.mrb[0].mxu0 %vm286_vm0, %v283_v4 }
 0x14e   : > { %v576_v8 = vpop.f32.mrb[0].mxu0 }
 0x14f   : > { %v365_v9 = vpop.f32.mrb[1].mxu0  ;;  %v391_v13 = vmul.f32 %v576_v8, %v565_v7  ;;  %v381_v15 = vsel %vm379_vm3, %v576_v8, -1e+30 }
 0x150   : > { %v380_v10 = vsel %vm378_vm2, %v365_v9, -1e+30  ;;  %v390_v11 = vmul.f32 %v564_v6, %v365_v9  ;;  %v385_v16 = vsel %vm286_vm0, %v381_v15, -inf }
 0x151   : > { %v382_v12 = vsel %vm286_vm0, %v380_v10, -inf  ;;  %v395_v17 = vsel %vm286_vm0, %v391_v13, 0.0 }
 0x152   : > { %383 = vmax.xlane.f32.xlu0 %v382_v12  ;;  %v392_v14 = vsel %vm286_vm0, %v390_v11, 0.0 }
 0x153   : > { %393 = vadd.xlane.f32.xlu1 %v392_v14 }
 0x156   : > { %386 = vmax.xlane.f32.xlu0 %v385_v16 }
 0x157   : > { %396 = vadd.xlane.f32.xlu1 %v395_v17 }
 0x1df   : > { %v384_v18 = vpop.xlane.xlu0 %383 }
 0x1e0   : > { %v388_v19 = vmax.f32 %v384_v18, -1e+30  ;;  %v394_v20 = vpop.xlane.xlu1 %393 }
 0x1e1   : > { %v400_v21 = vmul.f32 0.0625, %v394_v20 }
 0x1e3   : > { %v402_v22 = vsub.f32 %v388_v19, %v400_v21  ;;  %v387_v23 = vpop.xlane.xlu0 %386 }
 0x1e4   : > { %v389_v24 = vmax.f32 %v387_v23, -1e+30  ;;  %v397_v25 = vpop.xlane.xlu1 %396 }
 0x1e5   : > { %405 = vst.msk [vmem:[%s280_s21] sm:$0xff] %vm404_vm4, %v402_v22  ;;  %v401_v26 = vmul.f32 0.0625, %v397_v25 }
 0x1e7   : > { %v403_v27 = vsub.f32 %v389_v24, %v401_v26 }
 0x1e9   : > { %406 = vst.msk [vmem:[%s280_s21 + $0x8] sm:$0xff] %vm404_vm4, %v403_v27 }
 0x1ea PF: > { %s19_s17 = sadd.s32 1, %s804_s17   ;;  %s1071_s12 = smov %s788_s13 }
 0x1eb   : > { %p16_p9 = scmp.ge.s32.totalorder %s19_s17, 10   ;;  %s1072_s13 = smov %s792_s14 }
 0x1ec   : > { %s1073_s14 = smov %s920_s27  ;;  %s1074_s15 = smov %s800_s16 }
 0x1ed   : > { %s1075_s16 = smov %s1077_s25  ;;  %18 = sbr.rel (!%p16_p9) target bundleno = 6 (0x6), region = 90 }
 0x1f4   :  { %437 = vsyncpa [#allocation3], 1 }
 0x1f5   :  { %439 = vsyncpa [#allocation3 + $0x1], 1 }
 0x1f6   :  { %440 = vsyncpa [#allocation5], 1 }
 0x1f7   :  { %442 = vsyncpa [#allocation5 + $0x1], 1 }

</bundles_post_ra>
